<compile_context>
chip_gen: v6e
topology: v6e:2x2x1
jax: 0.10.0
libtpu: 0.0.40
codegen_flags: <defaults>
</compile_context>

<pallas_src>
import functools

import jax
import jax.numpy as jnp
from jax.experimental import pallas as pl
from jax.experimental.pallas import tpu as pltpu


def _round_up(n, m):
    return ((n + m - 1) // m) * m


def _physical_vmem_bytes():
    try:
        return int(pltpu.get_tpu_info().vmem_capacity_bytes)
    except Exception:
        return 64 * 1024 * 1024  # conservative (v7x-sized) fallback


def _vmem_need_bytes(tm_eff, d_model, d_ff, wbytes):
    # Weights / biases counted once (single-buffered), x/out tiles double-
    # buffered, bf16 hidden activation, plus f32 residual/LN temporaries.
    weights = (d_model * d_ff + d_ff * d_model) * wbytes + d_ff * wbytes + d_model * 4
    io_tiles = 4 * tm_eff * d_model * 4
    hidden = 2 * tm_eff * d_ff * wbytes
    epilogue = 6 * tm_eff * d_model * 4
    return weights + io_tiles + hidden + epilogue


def _ffn_ln_kernel(x_ref, w1_ref, b1_ref, w2_ref, b2_ref, alpha_ref, beta_ref,
                   o_ref, *, eps):
    x = x_ref[...]                                           # (tm, D) f32
    mm_dtype = w1_ref.dtype

    # fc1: MXU matmul, f32 accumulate; bias + ReLU in bf16 (native VPU on
    # v6e/v7x, halves the (tm, F) elementwise traffic; still correct on v5e).
    h = jnp.dot(x.astype(mm_dtype), w1_ref[...],
                preferred_element_type=jnp.float32)
    h = jnp.maximum(h.astype(mm_dtype) + b1_ref[...], 0.0)   # (tm, F) bf16

    # fc2: bf16 LHS straight into the MXU, f32 accumulate, f32 bias.
    y = jnp.dot(h, w2_ref[...], preferred_element_type=jnp.float32)
    y = y + b2_ref[...]                                      # (tm, D) f32

    # TODO(synk): dropout omitted (identity / eval mode).

    # Residual + LayerNormalization (scalar alpha/bias, unbiased std, eps on
    # std).  Single-pass statistics: sum and sum-of-squares together.
    z = x + y
    d = z.shape[-1]
    s1 = jnp.sum(z, axis=-1, keepdims=True)
    s2 = jnp.sum(z * z, axis=-1, keepdims=True)
    mean = s1 * (1.0 / float(d))
    var_unbiased = (s2 - mean * s1) * (1.0 / float(d - 1))
    std = jnp.sqrt(jnp.maximum(var_unbiased, 0.0))

    alpha = alpha_ref[0]                                     # SMEM scalars
    beta = beta_ref[0]
    scale = alpha * pl.reciprocal(std + eps, approx=True)    # per-row, EUP
    o_ref[...] = ((z - mean) * scale + beta).astype(o_ref.dtype)


def feed_forward_block(x, w1, b1, w2, b2, alpha, beta, *, eps=1e-12,
                       tm=None, matmul_dtype=jnp.bfloat16):
    """x: (B, S, D) float32. Returns (B, S, D) float32.

    tm: row tile (rows = B*S). Default (None) auto-picks the largest of
    {512, 256, 128, 64} that fits the chip's VMEM with single-buffered
    weights; it is further shrunk so the row grid has >= 2 steps (v7x).
    """
    B, S, D = x.shape
    F = w1.shape[1]
    rows = B * S
    wbytes = jnp.dtype(matmul_dtype).itemsize

    phys_vmem = _physical_vmem_bytes()
    vmem_cap = int(phys_vmem * 0.80)  # headroom for Mosaic internal scratch

    if tm is None:
        tm = 64
        for cand in (512, 256, 128, 64):
            if int(1.2 * _vmem_need_bytes(cand, D, F, wbytes)) <= vmem_cap:
                tm = cand
                break

    # Shrink the tile for tiny inputs; guarantee >= 2 grid steps when rows > 8
    # so the "parallel" row axis can shard across v7x's two TensorCores.
    rows8 = _round_up(rows, 8)
    tm_eff = max(8, min(tm, rows8))
    if rows8 >= 16 and _round_up(rows8, tm_eff) // tm_eff < 2:
        tm_eff = _round_up(rows8 // 2, 8)
    rows_p = _round_up(rows, tm_eff)

    x2 = x.reshape(rows, D)
    if rows_p != rows:
        x2 = jnp.pad(x2, ((0, rows_p - rows), (0, 0)))

    # Weights + b1 in bf16 (MXU / bf16-epilogue path); b2 stays f32.
    w1c = w1.astype(matmul_dtype)
    w2c = w2.astype(matmul_dtype)
    b1c = b1.reshape(1, F).astype(matmul_dtype)
    b2_2 = b2.reshape(1, D).astype(jnp.float32)
    alpha_1 = alpha.reshape(1).astype(jnp.float32)
    beta_1 = beta.reshape(1).astype(jnp.float32)

    need = _vmem_need_bytes(tm_eff, D, F, wbytes)
    vmem_limit = int(min(vmem_cap, max(32 * 1024 * 1024, int(1.5 * need))))

    cost = pl.CostEstimate(
        flops=4 * rows_p * D * F + 12 * rows_p * D,
        transcendentals=2 * rows_p,               # sqrt + reciprocal per row
        bytes_accessed=(2 * rows_p * D * 4
                        + (D * F + F * D + F) * wbytes + D * 4),
    )

    kernel = functools.partial(_ffn_ln_kernel, eps=eps)

    def _call(single_buffer_weights):
        weight_kw = {}
        if single_buffer_weights:
            # Grid-invariant operands: one resident buffer is enough.
            weight_kw = dict(pipeline_mode=pl.Buffered(1))
        in_specs = [
            pl.BlockSpec((tm_eff, D), lambda i: (i, 0)),              # x tile
            pl.BlockSpec((D, F), lambda i: (0, 0), **weight_kw),      # W1
            pl.BlockSpec((1, F), lambda i: (0, 0), **weight_kw),      # b1
            pl.BlockSpec((F, D), lambda i: (0, 0), **weight_kw),      # W2
            pl.BlockSpec((1, D), lambda i: (0, 0), **weight_kw),      # b2
            pl.BlockSpec(memory_space=pltpu.MemorySpace.SMEM),        # alpha
            pl.BlockSpec(memory_space=pltpu.MemorySpace.SMEM),        # bias
        ]
        out_specs = pl.BlockSpec((tm_eff, D), lambda i: (i, 0))
        return pl.pallas_call(
            kernel,
            out_shape=jax.ShapeDtypeStruct((rows_p, D), x.dtype),
            grid_spec=pltpu.PrefetchScalarGridSpec(
                num_scalar_prefetch=0,
                grid=(rows_p // tm_eff,),
                in_specs=in_specs,
                out_specs=out_specs,
            ),
            compiler_params=pltpu.CompilerParams(
                dimension_semantics=("parallel",),
                vmem_limit_bytes=vmem_limit),
            cost_estimate=cost,
        )(x2, w1c, b1c, w2c, b2_2, alpha_1, beta_1)

    try:
        out = _call(True)
    except Exception:
        # Fallback if pl.Buffered(1) single-buffering is not supported here.
        out = _call(False)

    # TODO(synk): for d_ff far beyond BERT sizes on v7x, add an F-axis
    # reduction grid with an f32 accumulator instead of whole-resident weights.

    if rows_p != rows:
        out = out[:rows]
    return out.reshape(B, S, D)


def _reference(x, w1, b1, w2, b2, alpha, beta, eps=1e-12,
               matmul_dtype=jnp.bfloat16):
    # Mirrors the kernel's dtype plan (bf16 matmul operands + bf16 bias/ReLU,
    # f32 accumulate, f32 residual + LayerNorm) for an apples-to-apples check.
    h = jnp.dot(x.astype(matmul_dtype), w1.astype(matmul_dtype),
                preferred_element_type=jnp.float32)
    h = jnp.maximum(h.astype(matmul_dtype) + b1.astype(matmul_dtype), 0.0)
    y = jnp.dot(h, w2.astype(matmul_dtype),
                preferred_element_type=jnp.float32) + b2
    z = x + y
    mean = jnp.mean(z, axis=-1, keepdims=True)
    std = jnp.std(z, axis=-1, keepdims=True, ddof=1)   # torch.std is unbiased
    return alpha * (z - mean) / (std + eps) + beta


if __name__ == "__main__":
    B, S, d_model, d_ff = 2, 8, 32, 64

    key = jax.random.PRNGKey(0)
    kx, k1, k2, k3, k4 = jax.random.split(key, 5)

    # Deterministic parameter init (matches nn.Linear shapes; synthetic values).
    bound1 = 1.0 / (d_model ** 0.5)
    bound2 = 1.0 / (d_ff ** 0.5)
    w1 = jax.random.uniform(k1, (d_model, d_ff), jnp.float32, -bound1, bound1)
    b1 = jax.random.uniform(k2, (d_ff,), jnp.float32, -bound1, bound1)
    w2 = jax.random.uniform(k3, (d_ff, d_model), jnp.float32, -bound2, bound2)
    b2 = jax.random.uniform(k4, (d_model,), jnp.float32, -bound2, bound2)
    alpha = jnp.ones((1,), jnp.float32)   # LayerNormalization.alpha
    beta = jnp.zeros((1,), jnp.float32)   # LayerNormalization.bias

    x = jax.random.normal(kx, (B, S, d_model), jnp.float32)

    out = feed_forward_block(x, w1, b1, w2, b2, alpha, beta)
    out = jax.block_until_ready(out)

    ref = _reference(x, w1, b1, w2, b2, alpha, beta)
    assert out.shape == (B, S, d_model)
    assert jnp.allclose(out, ref, atol=5e-3, rtol=5e-3), "mismatch vs reference"

    print("KERNEL_OK")
</pallas_src>

<mosaic_0001>
module attributes {stable_mosaic.version = 11 : i64} {
  func.func @_ffn_ln_kernel(%arg0: i32, %arg1: memref<8x32xf32, #tpu.memory_space<vmem>>, %arg2: memref<32x64xbf16, #tpu.memory_space<vmem>>, %arg3: memref<1x64xbf16, #tpu.memory_space<vmem>>, %arg4: memref<64x32xbf16, #tpu.memory_space<vmem>>, %arg5: memref<1x32xf32, #tpu.memory_space<vmem>>, %arg6: memref<1xf32, #tpu.memory_space<smem>>, %arg7: memref<1xf32, #tpu.memory_space<smem>>, %arg8: memref<8x32xf32, #tpu.memory_space<vmem>>) attributes {dimension_semantics = [#tpu.dimension_semantics<parallel>], iteration_bounds = array<i64: 2>, scalar_prefetch = 0 : i64, scratch_operands = 0 : i64, tpu.core_type = #tpu.core_type<tc>, window_params = [{transform_indices = @transform_0, window_bounds = array<i64: 8, 32>}, {pipeline_mode = #tpu.pipeline_mode<synchronous>, transform_indices = @transform_1, window_bounds = array<i64: 32, 64>}, {pipeline_mode = #tpu.pipeline_mode<synchronous>, transform_indices = @transform_2, window_bounds = array<i64: 1, 64>}, {pipeline_mode = #tpu.pipeline_mode<synchronous>, transform_indices = @transform_3, window_bounds = array<i64: 64, 32>}, {pipeline_mode = #tpu.pipeline_mode<synchronous>, transform_indices = @transform_4, window_bounds = array<i64: 1, 32>}, {transform_indices = @transform_5, window_bounds = array<i64: 1>}, {transform_indices = @transform_6, window_bounds = array<i64: 1>}, {transform_indices = @transform_7, window_bounds = array<i64: 8, 32>}]} {
    %c0 = arith.constant 0 : index
    %c0_0 = arith.constant 0 : index
    %0 = vector.load %arg1[%c0, %c0_0] : memref<8x32xf32, #tpu.memory_space<vmem>>, vector<8x32xf32>
    %1 = arith.truncf %0 : vector<8x32xf32> to vector<8x32xbf16>
    %c0_1 = arith.constant 0 : index
    %c0_2 = arith.constant 0 : index
    %2 = vector.load %arg2[%c0_1, %c0_2] : memref<32x64xbf16, #tpu.memory_space<vmem>>, vector<32x64xbf16>
    %cst = arith.constant dense<0.000000e+00> : vector<8x64xf32>
    %3 = tpu.matmul %1, %2, %cst {dimension_numbers = #tpu.dot_dimension_numbers<[1], [0], [0], [1], [0, 0, 1, 1], [], []>} : vector<8x32xbf16>, vector<32x64xbf16>, vector<8x64xf32> -> vector<8x64xf32>
    %4 = arith.truncf %3 : vector<8x64xf32> to vector<8x64xbf16>
    %c0_3 = arith.constant 0 : index
    %c0_4 = arith.constant 0 : index
    %5 = vector.load %arg3[%c0_3, %c0_4] : memref<1x64xbf16, #tpu.memory_space<vmem>>, vector<1x64xbf16>
    %6 = vector.broadcast %5 : vector<1x64xbf16> to vector<8x64xbf16>
    %7 = arith.addf %4, %6 : vector<8x64xbf16>
    %cst_5 = arith.constant 0.000000e+00 : bf16
    %8 = vector.broadcast %cst_5 : bf16 to vector<8x64xbf16>
    %9 = arith.maximumf %7, %8 : vector<8x64xbf16>
    %c0_6 = arith.constant 0 : index
    %c0_7 = arith.constant 0 : index
    %10 = vector.load %arg4[%c0_6, %c0_7] : memref<64x32xbf16, #tpu.memory_space<vmem>>, vector<64x32xbf16>
    %cst_8 = arith.constant dense<0.000000e+00> : vector<8x32xf32>
    %11 = tpu.matmul %9, %10, %cst_8 {dimension_numbers = #tpu.dot_dimension_numbers<[1], [0], [0], [1], [0, 0, 1, 1], [], []>} : vector<8x64xbf16>, vector<64x32xbf16>, vector<8x32xf32> -> vector<8x32xf32>
    %c0_9 = arith.constant 0 : index
    %c0_10 = arith.constant 0 : index
    %12 = vector.load %arg5[%c0_9, %c0_10] : memref<1x32xf32, #tpu.memory_space<vmem>>, vector<1x32xf32>
    %13 = vector.broadcast %12 : vector<1x32xf32> to vector<8x32xf32>
    %14 = arith.addf %11, %13 : vector<8x32xf32>
    %15 = arith.addf %0, %14 : vector<8x32xf32>
    %cst_11 = arith.constant dense<0.000000e+00> : vector<8xf32>
    %16 = vector.multi_reduction <add>, %15, %cst_11 [1] : vector<8x32xf32> to vector<8xf32>
    %17 = vector.shape_cast %16 : vector<8xf32> to vector<8x1xf32>
    %18 = arith.mulf %15, %15 : vector<8x32xf32>
    %cst_12 = arith.constant dense<0.000000e+00> : vector<8xf32>
    %19 = vector.multi_reduction <add>, %18, %cst_12 [1] : vector<8x32xf32> to vector<8xf32>
    %20 = vector.shape_cast %19 : vector<8xf32> to vector<8x1xf32>
    %cst_13 = arith.constant 3.125000e-02 : f32
    %21 = vector.broadcast %cst_13 : f32 to vector<8x1xf32>
    %22 = arith.mulf %17, %21 : vector<8x1xf32>
    %23 = arith.mulf %22, %17 : vector<8x1xf32>
    %24 = arith.subf %20, %23 : vector<8x1xf32>
    %cst_14 = arith.constant 0.0322580636 : f32
    %25 = vector.broadcast %cst_14 : f32 to vector<8x1xf32>
    %26 = arith.mulf %24, %25 : vector<8x1xf32>
    %cst_15 = arith.constant 0.000000e+00 : f32
    %27 = vector.broadcast %cst_15 : f32 to vector<8x1xf32>
    %28 = arith.maximumf %26, %27 : vector<8x1xf32>
    %29 = math.sqrt %28 : vector<8x1xf32>
    %c0_16 = arith.constant 0 : index
    %30 = memref.load %arg6[%c0_16] : memref<1xf32, #tpu.memory_space<smem>>
    %c0_17 = arith.constant 0 : index
    %31 = memref.load %arg7[%c0_17] : memref<1xf32, #tpu.memory_space<smem>>
    %cst_18 = arith.constant 9.99999996E-13 : f32
    %32 = vector.broadcast %cst_18 : f32 to vector<8x1xf32>
    %33 = arith.addf %29, %32 : vector<8x1xf32>
    %34 = tpu.reciprocal %33 {approx = true} : vector<8x1xf32> -> vector<8x1xf32>
    %35 = vector.broadcast %30 : f32 to vector<8x1xf32>
    %36 = arith.mulf %35, %34 : vector<8x1xf32>
    %37 = vector.broadcast %22 : vector<8x1xf32> to vector<8x32xf32>
    %38 = arith.subf %15, %37 : vector<8x32xf32>
    %39 = vector.broadcast %36 : vector<8x1xf32> to vector<8x32xf32>
    %40 = arith.mulf %38, %39 : vector<8x32xf32>
    %41 = vector.broadcast %31 : f32 to vector<8x32xf32>
    %42 = arith.addf %40, %41 : vector<8x32xf32>
    %c0_19 = arith.constant 0 : index
    %c0_20 = arith.constant 0 : index
    %43 = vector.load %arg8[%c0_19, %c0_20] : memref<8x32xf32, #tpu.memory_space<vmem>>, vector<8x32xf32>
    tpu.vector_store %arg8[%c0_19, %c0_20], %42 {strides = array<i32>} : memref<8x32xf32, #tpu.memory_space<vmem>>, vector<8x32xf32>,
    return
  }
  func.func @transform_0(%arg0: i32) -> (i32, i32) {
    %c0_i32 = arith.constant 0 : i32
    %c0_i32_0 = arith.constant 0 : i32
    return %arg0, %c0_i32 : i32, i32
  }
  func.func @transform_1(%arg0: i32) -> (i32, i32) {
    %c0_i32 = arith.constant 0 : i32
    %c0_i32_0 = arith.constant 0 : i32
    %c0_i32_1 = arith.constant 0 : i32
    return %c0_i32, %c0_i32_0 : i32, i32
  }
  func.func @transform_2(%arg0: i32) -> (i32, i32) {
    %c0_i32 = arith.constant 0 : i32
    %c0_i32_0 = arith.constant 0 : i32
    %c0_i32_1 = arith.constant 0 : i32
    return %c0_i32, %c0_i32_0 : i32, i32
  }
  func.func @transform_3(%arg0: i32) -> (i32, i32) {
    %c0_i32 = arith.constant 0 : i32
    %c0_i32_0 = arith.constant 0 : i32
    %c0_i32_1 = arith.constant 0 : i32
    return %c0_i32, %c0_i32_0 : i32, i32
  }
  func.func @transform_4(%arg0: i32) -> (i32, i32) {
    %c0_i32 = arith.constant 0 : i32
    %c0_i32_0 = arith.constant 0 : i32
    %c0_i32_1 = arith.constant 0 : i32
    return %c0_i32, %c0_i32_0 : i32, i32
  }
  func.func @transform_5(%arg0: i32) -> i32 {
    %c0_i32 = arith.constant 0 : i32
    %c0_i32_0 = arith.constant 0 : i32
    return %c0_i32 : i32
  }
  func.func @transform_6(%arg0: i32) -> i32 {
    %c0_i32 = arith.constant 0 : i32
    %c0_i32_0 = arith.constant 0 : i32
    return %c0_i32 : i32
  }
  func.func @transform_7(%arg0: i32) -> (i32, i32) {
    %c0_i32 = arith.constant 0 : i32
    %c0_i32_0 = arith.constant 0 : i32
    return %arg0, %c0_i32 : i32, i32
  }
}

module attributes {stable_mosaic.version = 11 : i64} {
  func.func @_ffn_ln_kernel(%arg0: i32, %arg1: memref<8x32xf32, #tpu.memory_space<vmem>>, %arg2: memref<32x64xbf16, #tpu.memory_space<vmem>>, %arg3: memref<1x64xbf16, #tpu.memory_space<vmem>>, %arg4: memref<64x32xbf16, #tpu.memory_space<vmem>>, %arg5: memref<1x32xf32, #tpu.memory_space<vmem>>, %arg6: memref<1xf32, #tpu.memory_space<smem>>, %arg7: memref<1xf32, #tpu.memory_space<smem>>, %arg8: memref<8x32xf32, #tpu.memory_space<vmem>>) attributes {dimension_semantics = [#tpu.dimension_semantics<parallel>], iteration_bounds = array<i64: 2>, scalar_prefetch = 0 : i64, scratch_operands = 0 : i64, tpu.core_type = #tpu.core_type<tc>, window_params = [{transform_indices = @transform_0, window_bounds = array<i64: 8, 32>}, {pipeline_mode = #tpu.pipeline_mode<synchronous>, transform_indices = @transform_1, window_bounds = array<i64: 32, 64>}, {pipeline_mode = #tpu.pipeline_mode<synchronous>, transform_indices = @transform_2, window_bounds = array<i64: 1, 64>}, {pipeline_mode = #tpu.pipeline_mode<synchronous>, transform_indices = @transform_3, window_bounds = array<i64: 64, 32>}, {pipeline_mode = #tpu.pipeline_mode<synchronous>, transform_indices = @transform_4, window_bounds = array<i64: 1, 32>}, {transform_indices = @transform_5, window_bounds = array<i64: 1>}, {transform_indices = @transform_6, window_bounds = array<i64: 1>}, {transform_indices = @transform_7, window_bounds = array<i64: 8, 32>}]} {
    %c0 = arith.constant 0 : index
    %c0_0 = arith.constant 0 : index
    %0 = vector.load %arg1[%c0, %c0_0] : memref<8x32xf32, #tpu.memory_space<vmem>>, vector<8x32xf32>
    %1 = arith.truncf %0 : vector<8x32xf32> to vector<8x32xbf16>
    %c0_1 = arith.constant 0 : index
    %c0_2 = arith.constant 0 : index
    %2 = vector.load %arg2[%c0_1, %c0_2] : memref<32x64xbf16, #tpu.memory_space<vmem>>, vector<32x64xbf16>
    %cst = arith.constant dense<0.000000e+00> : vector<8x64xf32>
    %3 = tpu.matmul %1, %2, %cst {dimension_numbers = #tpu.dot_dimension_numbers<[1], [0], [0], [1], [0, 0, 1, 1], [], []>} : vector<8x32xbf16>, vector<32x64xbf16>, vector<8x64xf32> -> vector<8x64xf32>
    %4 = arith.truncf %3 : vector<8x64xf32> to vector<8x64xbf16>
    %c0_3 = arith.constant 0 : index
    %c0_4 = arith.constant 0 : index
    %5 = vector.load %arg3[%c0_3, %c0_4] : memref<1x64xbf16, #tpu.memory_space<vmem>>, vector<1x64xbf16>
    %6 = vector.broadcast %5 : vector<1x64xbf16> to vector<8x64xbf16>
    %7 = arith.addf %4, %6 : vector<8x64xbf16>
    %cst_5 = arith.constant 0.000000e+00 : bf16
    %8 = vector.broadcast %cst_5 : bf16 to vector<8x64xbf16>
    %9 = arith.maximumf %7, %8 : vector<8x64xbf16>
    %c0_6 = arith.constant 0 : index
    %c0_7 = arith.constant 0 : index
    %10 = vector.load %arg4[%c0_6, %c0_7] : memref<64x32xbf16, #tpu.memory_space<vmem>>, vector<64x32xbf16>
    %cst_8 = arith.constant dense<0.000000e+00> : vector<8x32xf32>
    %11 = tpu.matmul %9, %10, %cst_8 {dimension_numbers = #tpu.dot_dimension_numbers<[1], [0], [0], [1], [0, 0, 1, 1], [], []>} : vector<8x64xbf16>, vector<64x32xbf16>, vector<8x32xf32> -> vector<8x32xf32>
    %c0_9 = arith.constant 0 : index
    %c0_10 = arith.constant 0 : index
    %12 = vector.load %arg5[%c0_9, %c0_10] : memref<1x32xf32, #tpu.memory_space<vmem>>, vector<1x32xf32>
    %13 = vector.broadcast %12 : vector<1x32xf32> to vector<8x32xf32>
    %14 = arith.addf %11, %13 : vector<8x32xf32>
    %15 = arith.addf %0, %14 : vector<8x32xf32>
    %cst_11 = arith.constant dense<0.000000e+00> : vector<8xf32>
    %16 = vector.multi_reduction <add>, %15, %cst_11 [1] : vector<8x32xf32> to vector<8xf32>
    %17 = vector.shape_cast %16 : vector<8xf32> to vector<8x1xf32>
    %18 = arith.mulf %15, %15 : vector<8x32xf32>
    %cst_12 = arith.constant dense<0.000000e+00> : vector<8xf32>
    %19 = vector.multi_reduction <add>, %18, %cst_12 [1] : vector<8x32xf32> to vector<8xf32>
    %20 = vector.shape_cast %19 : vector<8xf32> to vector<8x1xf32>
    %cst_13 = arith.constant 3.125000e-02 : f32
    %21 = vector.broadcast %cst_13 : f32 to vector<8x1xf32>
    %22 = arith.mulf %17, %21 : vector<8x1xf32>
    %23 = arith.mulf %22, %17 : vector<8x1xf32>
    %24 = arith.subf %20, %23 : vector<8x1xf32>
    %cst_14 = arith.constant 0.0322580636 : f32
    %25 = vector.broadcast %cst_14 : f32 to vector<8x1xf32>
    %26 = arith.mulf %24, %25 : vector<8x1xf32>
    %cst_15 = arith.constant 0.000000e+00 : f32
    %27 = vector.broadcast %cst_15 : f32 to vector<8x1xf32>
    %28 = arith.maximumf %26, %27 : vector<8x1xf32>
    %29 = math.sqrt %28 : vector<8x1xf32>
    %c0_16 = arith.constant 0 : index
    %30 = memref.load %arg6[%c0_16] : memref<1xf32, #tpu.memory_space<smem>>
    %c0_17 = arith.constant 0 : index
    %31 = memref.load %arg7[%c0_17] : memref<1xf32, #tpu.memory_space<smem>>
    %cst_18 = arith.constant 9.99999996E-13 : f32
    %32 = vector.broadcast %cst_18 : f32 to vector<8x1xf32>
    %33 = arith.addf %29, %32 : vector<8x1xf32>
    %34 = tpu.reciprocal %33 {approx = true} : vector<8x1xf32> -> vector<8x1xf32>
    %35 = vector.broadcast %30 : f32 to vector<8x1xf32>
    %36 = arith.mulf %35, %34 : vector<8x1xf32>
    %37 = vector.broadcast %22 : vector<8x1xf32> to vector<8x32xf32>
    %38 = arith.subf %15, %37 : vector<8x32xf32>
    %39 = vector.broadcast %36 : vector<8x1xf32> to vector<8x32xf32>
    %40 = arith.mulf %38, %39 : vector<8x32xf32>
    %41 = vector.broadcast %31 : f32 to vector<8x32xf32>
    %42 = arith.addf %40, %41 : vector<8x32xf32>
    %c0_19 = arith.constant 0 : index
    %c0_20 = arith.constant 0 : index
    %43 = vector.load %arg8[%c0_19, %c0_20] : memref<8x32xf32, #tpu.memory_space<vmem>>, vector<8x32xf32>
    tpu.vector_store %arg8[%c0_19, %c0_20], %42 {strides = array<i32>} : memref<8x32xf32, #tpu.memory_space<vmem>>, vector<8x32xf32>,
    return
  }
  func.func @transform_0(%arg0: i32) -> (i32, i32) {
    %c0_i32 = arith.constant 0 : i32
    %c0_i32_0 = arith.constant 0 : i32
    return %arg0, %c0_i32 : i32, i32
  }
  func.func @transform_1(%arg0: i32) -> (i32, i32) {
    %c0_i32 = arith.constant 0 : i32
    %c0_i32_0 = arith.constant 0 : i32
    %c0_i32_1 = arith.constant 0 : i32
    return %c0_i32, %c0_i32_0 : i32, i32
  }
  func.func @transform_2(%arg0: i32) -> (i32, i32) {
    %c0_i32 = arith.constant 0 : i32
    %c0_i32_0 = arith.constant 0 : i32
    %c0_i32_1 = arith.constant 0 : i32
    return %c0_i32, %c0_i32_0 : i32, i32
  }
  func.func @transform_3(%arg0: i32) -> (i32, i32) {
    %c0_i32 = arith.constant 0 : i32
    %c0_i32_0 = arith.constant 0 : i32
    %c0_i32_1 = arith.constant 0 : i32
    return %c0_i32, %c0_i32_0 : i32, i32
  }
  func.func @transform_4(%arg0: i32) -> (i32, i32) {
    %c0_i32 = arith.constant 0 : i32
    %c0_i32_0 = arith.constant 0 : i32
    %c0_i32_1 = arith.constant 0 : i32
    return %c0_i32, %c0_i32_0 : i32, i32
  }
  func.func @transform_5(%arg0: i32) -> i32 {
    %c0_i32 = arith.constant 0 : i32
    %c0_i32_0 = arith.constant 0 : i32
    return %c0_i32 : i32
  }
  func.func @transform_6(%arg0: i32) -> i32 {
    %c0_i32 = arith.constant 0 : i32
    %c0_i32_0 = arith.constant 0 : i32
    return %c0_i32 : i32
  }
  func.func @transform_7(%arg0: i32) -> (i32, i32) {
    %c0_i32 = arith.constant 0 : i32
    %c0_i32_0 = arith.constant 0 : i32
    return %arg0, %c0_i32 : i32, i32
  }
}

</mosaic_0001>

<bundles_post_ra>
// kernel: tpu_custom_call.1
= control target key start
LH: loop header
LB: loop body
LE: loop exit
PB: predicated region body
PF: predicated region fallthrough
CT: control target
= control target key end

     0   :  { %s863_s0 = inlined_call_operand.vmem [shape: f32[16,32], index: 0, kind: input, shape index: {}]   ;;  %s864_s1 = inlined_call_operand.vmem [shape: bf16[32,64], index: 1, kind: input, shape index: {}]   ;;  %s865_s2 = inlined_call_operand.vmem [shape: bf16[1,64], index: 2, kind: input, shape index: {}]   ;;  %s866_s3 = inlined_call_operand.vmem [shape: bf16[64,32], index: 3, kind: input, shape index: {}]   ;;  %s867_s4 = inlined_call_operand.vmem [shape: f32[1,32], index: 4, kind: input, shape index: {}]   ;;  %s868_s5 = inlined_call_operand.<no memory space> [shape: f32[1], index: 5, kind: input, shape index: {}]   ;;  %s869_s6 = inlined_call_operand.<no memory space> [shape: f32[1], index: 6, kind: input, shape index: {}]   ;;  %s870_s7 = inlined_call_operand.hbm [shape: f32[16,32], index: 7, kind: output, shape index: {}]  }
   0x1   :  { %12 = sst [smem:[#allocation2]] %s868_s5 }
   0x2   :  { %13 = sst [smem:[#allocation3]] %s869_s6 }
   0x3   :  { %14 = vsyncpa [#allocation5], 0 }
   0x4   :  { %16 = vsyncpa [#allocation5 + $0x1], 0  ;;  %s748_s28 = smov 0   ;;  %s750_s29 = smov 0  }
   0x5   :  { %s752_s30 = smov 0   ;;  %s754_s8 = smov 0  }
   0x6 LB: > { %s769_s5 = sadd.s32 4294967295, %s696_s8   ;;  %s537_s6 = sadd.s32 4294967294, %s696_s8   ;;  %s696_s8 = sphi %s754_s8, %s876_s8   ;;  %s692_s30 = sphi %s752_s30, %s875_s30   ;;  %s688_s29 = sphi %s750_s29, %s874_s29   ;;  %s684_s28 = sphi %s748_s28, %s873_s28  }
   0x7   : > { %s773_s9 = sadd.s32 1, %s696_s8   ;;  %s181_s10 = sadd.s32 1, %s692_s30 }
   0x8   : > { %s178_s11 = ssub.s32 %s696_s8, %s773_s9  ;;  %p191_p0 = scmp.ne.s32.totalorder %s692_s30, %s688_s29 }
   0x9   : > { %p179_p1 = scmp.eq.s32.totalorder %s178_s11, 0  ;;  %p192_p2 = scmp.eq.s32.totalorder %s769_s5, 1 }
   0xa   : > { %p197_p3 = scmp.ne.s32.totalorder %s688_s29, %s684_s28  ;;  %p198_p4 = scmp.eq.s32.totalorder %s537_s6, 1 }
   0xb   : > { %s784_s12 = scalar_select %p179_p1, %s692_s30, %s181_s10  }
   0xc   : > { %p786_p5 = por %p192_p2, %p191_p0  ;;  %p790_p6 = por %p198_p4, %p197_p3 }
   0xd   : > { %p540_p7 = scmp.ge.s32.totalorder %s696_s8, 1  ;;  %p241_p8 = scmp.lt.s32.totalorder %s696_s8, 3 }
   0xf   : > { %p242_p9 = pnand %p540_p7, %p241_p8 }
  0x10   : > { %p272_p10 = scmp.lt.s32.totalorder (!%p242_p9), %s769_s5, 1  ;;  %s453_s20 = sld [smem:[#allocation2]] (!%p242_p9) }
  0x11   : > { %245 = sbr.rel (%p242_p9) target bundleno = 629 (0x275), region = 48  ;;  %s454_s22 = sld [smem:[#allocation3]] (!%p242_p9) }
  0x12   : > { %s701_s16 = smov (!%p242_p9), [#allocation4]  }
  0x13   : > { %s640_s17 = sshll.u32 (!%p242_p9), %s701_s16, 4  ;;  %s641_s17 = int_to_ptr.vmem [resolvable:$false] %s640_s17 }
  0x16   : > { %v626_v0 = vld [vmem:[%s864_s1 + $0x8] sm:$0xff]   ;;  %v698_v1 = vmov 0.0   ;;  %v627_v2 = vld [vmem:[%s864_s1] sm:$0xff]   ;;  %vm699_vm0 = vmmov 0   ;;  %v628_v3 = vld [vmem:[%s866_s3 + $0x18] sm:$0xff]   ;;  %s273_s21 = scalar_select %p272_p10, %s769_s5, 1  ;;  %v344_v9 = vlaneseq  ;;  %v457_v46 = vstv %s453_s20 }
  0x17   : > { %564 = vmatprep.subr.bf16.mxu0 %v698_v1  ;;  %572 = vmatprep.subr.bf16.mxu1 %v698_v1  ;;  %v629_v4 = vld [vmem:[%s866_s3 + $0x10] sm:$0xff]   ;;  %vm295_vm1 = vcmask 261120   ;;  %v630_v7 = vld [vmem:[%s866_s3 + $0x8] sm:$0xff]   ;;  %v631_v8 = vld [vmem:[%s866_s3] sm:$0xff]   ;;  %vm389_vm2 = vcmask 523264   ;;  %v700_v20 = vmov 0   ;;  %v461_v50 = vstv %s454_s22 }
  0x18   : > { %565 = vmatpush3.bf16.msra.mxu0 %v626_v0  ;;  %568 = vmatprep.mubr.msk.bf16.mxu0 %vm699_vm0, %v698_v1  ;;  %s542_s24 = sshll.u32 %s273_s21, 3  ;;  %v345_v10 = vshrl.u32 %v344_v9, 7  ;;  %v340_v11 = vld [vmem:[%s865_s2] sm:$0x1]  ;;  %s269_s21 = sand.u32 1, %s688_s29  }
  0x19   : > { %566 = vmatprep.subr.bf16.mxu0 %v698_v1  ;;  %580 = vmatprep.mubr.msk.bf16.mxu1 %vm699_vm0, %v698_v1  ;;  %s275_s27 = scalar_lea.vmem %s863_s0, %s542_s24  ;;  %v342_v12 = vpack.i.b16 %v340_v11, %v340_v11  ;;  %v546_v23 = vld [vmem:[%s867_s4] ss:$0 sm:$0xff]  ;;  %s541_s23 = sshll.u32 %s269_s21, 3 }
  0x1a   : > { %573 = vmatpush3.bf16.msra.mxu1 %v628_v3  ;;  %v277_v5 = vld [vmem:[%s275_s27] sm:$0xff]  ;;  %v346_v13 = vsub.s32 0, %v345_v10  ;;  %s553_s24 = sshll.u32 %s769_s5, 7  ;;  %s271_s25 = scalar_lea.vmem [#allocation4], %s541_s23 }
  0x1b   : > { %574 = vmatprep.subr.bf16.mxu1 %v698_v1  ;;  %v278_v6 = vpack.c.bf16 %v277_v5, %v277_v5  ;;  %s478_s26 = sshll.u32 %s271_s25, 4  ;;  %s476_s10 = scalar_lea.hbm %s870_s7, %s553_s24  ;;  %s479_s26 = int_to_ptr.vmem [resolvable:$true] %s478_s26 }
  0x1c   : > { %567 = vmatpush3.bf16.msra.mxu0 %v627_v2  ;;  %v347_v14 = vrot.slane %v342_v12, %v346_v13  ;;  %s465_s11 = scalar_lea.sflag [#allocation5], %s269_s21  ;;  %s636_s15 = scalar_lea.vmem %s479_s26, 128 }
  0x1d   : > { %p637_p11 = scmp.ne.s32.totalorder %s479_s26, %s636_s15  ;;  %s642_s5 = scalar_lea.vmem %s641_s17, 256 }
  0x1e   : > { %575 = vmatpush3.bf16.msra.mxu1 %v629_v4  ;;  %p643_p0 = scmp.lt.s32.totalorder %s479_s26, %s641_s17  ;;  %p644_p1 = scmp.lt.s32.totalorder %s642_s5, %s636_s15 }
  0x1f   : > { %576 = vmatprep.subr.bf16.mxu1 %v698_v1  ;;  %569 = vmatmul.mubr.msk.bf16.vlgmr.msra.gmra.mxu0 %vm295_vm1, %v278_v6  ;;  %p638_p12 = pnand %p637_p11, %p786_p5 }
  0x20   : > { %p645_p2 = por %p644_p1, %p643_p0 }
  0x21   : > { %p639_p13 = pneg %p638_p12 }
  0x22   : > { %577 = vmatpush3.bf16.msra.mxu1 %v630_v7 }
  0x23   : > { %578 = vmatprep.subr.bf16.mxu1 %v698_v1  ;;  %p646_p3 = pnand %p645_p2, %p639_p13 }
  0x26   : > { %579 = vmatpush3.bf16.msra.mxu1 %v631_v8 }
  0xdf   : > { %v333_v15 = vpop.f32.mrf.mxu0 }
  0xe0   : > { %v339_v16 = vpack.c.bf16 %v333_v15, %v333_v15 }
  0xe1   : > { %v570_v17 = vpop.f32.mrf.mxu0 }
  0xe2   : > { %v348_v18 = vadd.bf16 %v347_v14, %v339_v16 }
  0xe3   : > { %v336_v19 = vpop.f32.mrf.mxu0 }
  0xe4   : > { %v349_v21 = vmax.bf16 %v700_v20, %v348_v18 }
  0xe5   : > { %v571_v22 = vpop.f32.mrf.mxu0 }
  0xe6   : > { %581 = vmatmul.mubr.msk.bf16.vlgmr.msra.gmra.mxu1 %vm389_vm2, %v349_v21 }
 0x1a6   : > { %v427_v24 = vpop.f32.mrf.mxu1 }
 0x1a7   : > { %v428_v25 = vadd.f32 %v546_v23, %v427_v24 }
 0x1a8   : > { %v582_v26 = vpop.f32.mrf.mxu1 }
 0x1a9   : > { %v433_v27 = vadd.f32 %v428_v25, %v277_v5 }
 0x1aa   : > { %v430_v28 = vpop.f32.mrf.mxu1 }
 0x1ab   : > { %v434_v29 = vsel %vm295_vm1, %v433_v27, 0.0  ;;  %v437_v30 = vmul.f32 %v433_v27, %v433_v27 }
 0x1ac   : > { %435 = vadd.xlane.f32.xlu0 %v434_v29  ;;  %v583_v31 = vpop.f32.mrf.mxu1 }
 0x1ad   : > { %v438_v32 = vsel %vm295_vm1, %v437_v30, 0.0 }
 0x1b0   : > { %439 = vadd.xlane.f32.xlu0 %v438_v32 }
 0x235   : > { %v436_v33 = vpop.xlane.xlu0 %435 }
 0x236   : > { %v441_v34 = vmul.f32 0.03125, %v436_v33 }
 0x238   : > { %v442_v35 = vmul.f32 %v441_v34, %v436_v33  ;;  %v459_v48 = vsub.f32 %v433_v27, %v441_v34 }
 0x239   : > { %v440_v36 = vpop.xlane.xlu0 %439 }
 0x23a   : > { %v443_v37 = vsub.f32 %v440_v36, %v442_v35 }
 0x23c   : > { %v444_v38 = vmul.f32 0.032258064, %v443_v37 }
 0x23e   : > { %v445_v39 = vmax.f32 %v444_v38, 0.0 }
 0x240   : > { %632 = vrsqrt.f32 %v445_v39  ;;  %vm448_vm3 = vcmp.eq.f32.partialorder %v445_v39, inf  ;;  %v451_v42 = vand.u32 2147483648, %v445_v39  ;;  %vm450_vm4 = vcmp.eq.f32.partialorder %v445_v39, 0.0 }
 0x24d   : > { %v633_v40 = vpop.eup %632 }
 0x24e   : > { %v447_v41 = vmul.f32 %v633_v40, %v445_v39 }
 0x250   : > { %v449_v43 = vsel %vm448_vm3, %v445_v39, %v447_v41 }
 0x251   : > { %v452_v44 = vsel %vm450_vm4, %v451_v42, %v449_v43 }
 0x252   : > { %v455_v45 = vadd.f32 1e-12, %v452_v44 }
 0x254   : > { %634 = vrcp.f32 %v455_v45 }
 0x261   : > { %v635_v47 = vpop.eup %634 }
 0x262   : > { %v458_v49 = vmul.f32 %v635_v47, %v457_v46 }
 0x264   : > { %v460_v51 = vmul.f32 %v459_v48, %v458_v49 }
 0x266   : > { %v462_v52 = vadd.f32 %v461_v50, %v460_v51 }
 0x268   : > { %463 = vst.msk [vmem:[%s271_s25] sm:$0xff] %vm295_vm1, %v462_v52 }
 0x269   : > { %649 = shalt.err (!%p646_p3)
}
 0x26a   : > { %s650_s18 = scalar_lea.hbm %s476_s10, 128  ;;  %s654_s21 = scalar_lea.hbm %s870_s7, 256 }
 0x26b   : > { %p651_p4 = scmp.ne.s32.totalorder %s476_s10, %s650_s18  ;;  %p655_p9 = scmp.lt.s32.totalorder %s476_s10, %s870_s7 }
 0x26c   : > { %p656_p10 = scmp.lt.s32.totalorder %s654_s21, %s650_s18 }
 0x26d   : > { %p652_p7 = pnand %p651_p4, %p786_p5 }
 0x26e   : > { %p657_p11 = por %p656_p10, %p655_p9 }
 0x26f   : > { %p653_p8 = pneg %p652_p7 }
 0x271   : > { %p658_p12 = pnand %p657_p11, %p653_p8 }
 0x273   : > { %661 = shalt.err (!%p658_p12)
}
 0x274   : > { %584 = dma.vmem_to_hbm [thread:$0]  (%p786_p5), %s479_s26, 128, %s476_s10, %s465_s11  }
 0x275 PF: > { %p590_p13 = scmp.ge.s32.totalorder %s696_s8, 2  ;;  %s490_s24 = sand.u32 1, %s684_s28  }
 0x276   : > { %s491_s25 = scalar_lea.sflag [#allocation5], %s490_s24 }
 0x277   : > { %p587_p0 = pnand %p590_p13, %p790_p6 }
 0x279   : > { %p588_p1 = pneg %p587_p0 }
 0x27b   : > { %679 = dma.done.wait (%p588_p1), %s491_s25, 128  }
 0x27c   : > { %681 = vsyncadd (%p588_p1), %s491_s25, 4294967168  ;;  %p19_p2 = scmp.ge.s32.totalorder %s773_s9, 4   ;;  %s873_s28 = smov %s688_s29 }
 0x27d   : > { %s874_s29 = smov %s692_s30  ;;  %s875_s30 = smov %s784_s12 }
 0x27e   : > { %s876_s8 = smov %s773_s9  ;;  %21 = sbr.rel (!%p19_p2) target bundleno = 6 (0x6), region = 83 }
 0x283   :  { %496 = vsyncpa [#allocation5], 1 }
 0x284   :  { %498 = vsyncpa [#allocation5 + $0x1], 1 }

// kernel: tpu_custom_call.1
= control target key start
LH: loop header
LB: loop body
LE: loop exit
PB: predicated region body
PF: predicated region fallthrough
CT: control target
= control target key end

     0   :  { %s863_s0 = inlined_call_operand.vmem [shape: f32[16,32], index: 0, kind: input, shape index: {}]   ;;  %s864_s1 = inlined_call_operand.vmem [shape: bf16[32,64], index: 1, kind: input, shape index: {}]   ;;  %s865_s2 = inlined_call_operand.vmem [shape: bf16[1,64], index: 2, kind: input, shape index: {}]   ;;  %s866_s3 = inlined_call_operand.vmem [shape: bf16[64,32], index: 3, kind: input, shape index: {}]   ;;  %s867_s4 = inlined_call_operand.vmem [shape: f32[1,32], index: 4, kind: input, shape index: {}]   ;;  %s868_s5 = inlined_call_operand.<no memory space> [shape: f32[1], index: 5, kind: input, shape index: {}]   ;;  %s869_s6 = inlined_call_operand.<no memory space> [shape: f32[1], index: 6, kind: input, shape index: {}]   ;;  %s870_s7 = inlined_call_operand.hbm [shape: f32[16,32], index: 7, kind: output, shape index: {}]  }
   0x1   :  { %12 = sst [smem:[#allocation2]] %s868_s5 }
   0x2   :  { %13 = sst [smem:[#allocation3]] %s869_s6 }
   0x3   :  { %14 = vsyncpa [#allocation5], 0 }
   0x4   :  { %16 = vsyncpa [#allocation5 + $0x1], 0  ;;  %s748_s28 = smov 0   ;;  %s750_s29 = smov 0  }
   0x5   :  { %s752_s30 = smov 0   ;;  %s754_s8 = smov 0  }
   0x6 LB: > { %s769_s5 = sadd.s32 4294967295, %s696_s8   ;;  %s537_s6 = sadd.s32 4294967294, %s696_s8   ;;  %s696_s8 = sphi %s754_s8, %s876_s8   ;;  %s692_s30 = sphi %s752_s30, %s875_s30   ;;  %s688_s29 = sphi %s750_s29, %s874_s29   ;;  %s684_s28 = sphi %s748_s28, %s873_s28  }
   0x7   : > { %s773_s9 = sadd.s32 1, %s696_s8   ;;  %s181_s10 = sadd.s32 1, %s692_s30 }
   0x8   : > { %s178_s11 = ssub.s32 %s696_s8, %s773_s9  ;;  %p191_p0 = scmp.ne.s32.totalorder %s692_s30, %s688_s29 }
   0x9   : > { %p179_p1 = scmp.eq.s32.totalorder %s178_s11, 0  ;;  %p192_p2 = scmp.eq.s32.totalorder %s769_s5, 1 }
   0xa   : > { %p197_p3 = scmp.ne.s32.totalorder %s688_s29, %s684_s28  ;;  %p198_p4 = scmp.eq.s32.totalorder %s537_s6, 1 }
   0xb   : > { %s784_s12 = scalar_select %p179_p1, %s692_s30, %s181_s10  }
   0xc   : > { %p786_p5 = por %p192_p2, %p191_p0  ;;  %p790_p6 = por %p198_p4, %p197_p3 }
   0xd   : > { %p540_p7 = scmp.ge.s32.totalorder %s696_s8, 1  ;;  %p241_p8 = scmp.lt.s32.totalorder %s696_s8, 3 }
   0xf   : > { %p242_p9 = pnand %p540_p7, %p241_p8 }
  0x10   : > { %p272_p10 = scmp.lt.s32.totalorder (!%p242_p9), %s769_s5, 1  ;;  %s453_s20 = sld [smem:[#allocation2]] (!%p242_p9) }
  0x11   : > { %245 = sbr.rel (%p242_p9) target bundleno = 629 (0x275), region = 48  ;;  %s454_s22 = sld [smem:[#allocation3]] (!%p242_p9) }
  0x12   : > { %s701_s16 = smov (!%p242_p9), [#allocation4]  }
  0x13   : > { %s640_s17 = sshll.u32 (!%p242_p9), %s701_s16, 4  ;;  %s641_s17 = int_to_ptr.vmem [resolvable:$false] %s640_s17 }
  0x16   : > { %v626_v0 = vld [vmem:[%s864_s1 + $0x8] sm:$0xff]   ;;  %v698_v1 = vmov 0.0   ;;  %v627_v2 = vld [vmem:[%s864_s1] sm:$0xff]   ;;  %vm699_vm0 = vmmov 0   ;;  %v628_v3 = vld [vmem:[%s866_s3 + $0x18] sm:$0xff]   ;;  %s273_s21 = scalar_select %p272_p10, %s769_s5, 1  ;;  %v344_v9 = vlaneseq  ;;  %v457_v46 = vstv %s453_s20 }
  0x17   : > { %564 = vmatprep.subr.bf16.mxu0 %v698_v1  ;;  %572 = vmatprep.subr.bf16.mxu1 %v698_v1  ;;  %v629_v4 = vld [vmem:[%s866_s3 + $0x10] sm:$0xff]   ;;  %vm295_vm1 = vcmask 261120   ;;  %v630_v7 = vld [vmem:[%s866_s3 + $0x8] sm:$0xff]   ;;  %v631_v8 = vld [vmem:[%s866_s3] sm:$0xff]   ;;  %vm389_vm2 = vcmask 523264   ;;  %v700_v20 = vmov 0   ;;  %v461_v50 = vstv %s454_s22 }
  0x18   : > { %565 = vmatpush3.bf16.msra.mxu0 %v626_v0  ;;  %568 = vmatprep.mubr.msk.bf16.mxu0 %vm699_vm0, %v698_v1  ;;  %s542_s24 = sshll.u32 %s273_s21, 3  ;;  %v345_v10 = vshrl.u32 %v344_v9, 7  ;;  %v340_v11 = vld [vmem:[%s865_s2] sm:$0x1]  ;;  %s269_s21 = sand.u32 1, %s688_s29  }
  0x19   : > { %566 = vmatprep.subr.bf16.mxu0 %v698_v1  ;;  %580 = vmatprep.mubr.msk.bf16.mxu1 %vm699_vm0, %v698_v1  ;;  %s275_s27 = scalar_lea.vmem %s863_s0, %s542_s24  ;;  %v342_v12 = vpack.i.b16 %v340_v11, %v340_v11  ;;  %v546_v23 = vld [vmem:[%s867_s4] ss:$0 sm:$0xff]  ;;  %s541_s23 = sshll.u32 %s269_s21, 3 }
  0x1a   : > { %573 = vmatpush3.bf16.msra.mxu1 %v628_v3  ;;  %v277_v5 = vld [vmem:[%s275_s27] sm:$0xff]  ;;  %v346_v13 = vsub.s32 0, %v345_v10  ;;  %s553_s24 = sshll.u32 %s769_s5, 7  ;;  %s271_s25 = scalar_lea.vmem [#allocation4], %s541_s23 }
  0x1b   : > { %574 = vmatprep.subr.bf16.mxu1 %v698_v1  ;;  %v278_v6 = vpack.c.bf16 %v277_v5, %v277_v5  ;;  %s478_s26 = sshll.u32 %s271_s25, 4  ;;  %s476_s10 = scalar_lea.hbm %s870_s7, %s553_s24  ;;  %s479_s26 = int_to_ptr.vmem [resolvable:$true] %s478_s26 }
  0x1c   : > { %567 = vmatpush3.bf16.msra.mxu0 %v627_v2  ;;  %v347_v14 = vrot.slane %v342_v12, %v346_v13  ;;  %s465_s11 = scalar_lea.sflag [#allocation5], %s269_s21  ;;  %s636_s15 = scalar_lea.vmem %s479_s26, 128 }
  0x1d   : > { %p637_p11 = scmp.ne.s32.totalorder %s479_s26, %s636_s15  ;;  %s642_s5 = scalar_lea.vmem %s641_s17, 256 }
  0x1e   : > { %575 = vmatpush3.bf16.msra.mxu1 %v629_v4  ;;  %p643_p0 = scmp.lt.s32.totalorder %s479_s26, %s641_s17  ;;  %p644_p1 = scmp.lt.s32.totalorder %s642_s5, %s636_s15 }
  0x1f   : > { %576 = vmatprep.subr.bf16.mxu1 %v698_v1  ;;  %569 = vmatmul.mubr.msk.bf16.vlgmr.msra.gmra.mxu0 %vm295_vm1, %v278_v6  ;;  %p638_p12 = pnand %p637_p11, %p786_p5 }
  0x20   : > { %p645_p2 = por %p644_p1, %p643_p0 }
  0x21   : > { %p639_p13 = pneg %p638_p12 }
  0x22   : > { %577 = vmatpush3.bf16.msra.mxu1 %v630_v7 }
  0x23   : > { %578 = vmatprep.subr.bf16.mxu1 %v698_v1  ;;  %p646_p3 = pnand %p645_p2, %p639_p13 }
  0x26   : > { %579 = vmatpush3.bf16.msra.mxu1 %v631_v8 }
  0xdf   : > { %v333_v15 = vpop.f32.mrf.mxu0 }
  0xe0   : > { %v339_v16 = vpack.c.bf16 %v333_v15, %v333_v15 }
  0xe1   : > { %v570_v17 = vpop.f32.mrf.mxu0 }
  0xe2   : > { %v348_v18 = vadd.bf16 %v347_v14, %v339_v16 }
  0xe3   : > { %v336_v19 = vpop.f32.mrf.mxu0 }
  0xe4   : > { %v349_v21 = vmax.bf16 %v700_v20, %v348_v18 }
  0xe5   : > { %v571_v22 = vpop.f32.mrf.mxu0 }
  0xe6   : > { %581 = vmatmul.mubr.msk.bf16.vlgmr.msra.gmra.mxu1 %vm389_vm2, %v349_v21 }
 0x1a6   : > { %v427_v24 = vpop.f32.mrf.mxu1 }
 0x1a7   : > { %v428_v25 = vadd.f32 %v546_v23, %v427_v24 }
 0x1a8   : > { %v582_v26 = vpop.f32.mrf.mxu1 }
 0x1a9   : > { %v433_v27 = vadd.f32 %v428_v25, %v277_v5 }
 0x1aa   : > { %v430_v28 = vpop.f32.mrf.mxu1 }
 0x1ab   : > { %v434_v29 = vsel %vm295_vm1, %v433_v27, 0.0  ;;  %v437_v30 = vmul.f32 %v433_v27, %v433_v27 }
 0x1ac   : > { %435 = vadd.xlane.f32.xlu0 %v434_v29  ;;  %v583_v31 = vpop.f32.mrf.mxu1 }
 0x1ad   : > { %v438_v32 = vsel %vm295_vm1, %v437_v30, 0.0 }
 0x1b0   : > { %439 = vadd.xlane.f32.xlu0 %v438_v32 }
 0x235   : > { %v436_v33 = vpop.xlane.xlu0 %435 }
 0x236   : > { %v441_v34 = vmul.f32 0.03125, %v436_v33 }
 0x238   : > { %v442_v35 = vmul.f32 %v441_v34, %v436_v33  ;;  %v459_v48 = vsub.f32 %v433_v27, %v441_v34 }
 0x239   : > { %v440_v36 = vpop.xlane.xlu0 %439 }
 0x23a   : > { %v443_v37 = vsub.f32 %v440_v36, %v442_v35 }
 0x23c   : > { %v444_v38 = vmul.f32 0.032258064, %v443_v37 }
 0x23e   : > { %v445_v39 = vmax.f32 %v444_v38, 0.0 }
 0x240   : > { %632 = vrsqrt.f32 %v445_v39  ;;  %vm448_vm3 = vcmp.eq.f32.partialorder %v445_v39, inf  ;;  %v451_v42 = vand.u32 2147483648, %v445_v39  ;;  %vm450_vm4 = vcmp.eq.f32.partialorder %v445_v39, 0.0 }
 0x24d   : > { %v633_v40 = vpop.eup %632 }
 0x24e   : > { %v447_v41 = vmul.f32 %v633_v40, %v445_v39 }
 0x250   : > { %v449_v43 = vsel %vm448_vm3, %v445_v39, %v447_v41 }
 0x251   : > { %v452_v44 = vsel %vm450_vm4, %v451_v42, %v449_v43 }
 0x252   : > { %v455_v45 = vadd.f32 1e-12, %v452_v44 }
 0x254   : > { %634 = vrcp.f32 %v455_v45 }
 0x261   : > { %v635_v47 = vpop.eup %634 }
 0x262   : > { %v458_v49 = vmul.f32 %v635_v47, %v457_v46 }
 0x264   : > { %v460_v51 = vmul.f32 %v459_v48, %v458_v49 }
 0x266   : > { %v462_v52 = vadd.f32 %v461_v50, %v460_v51 }
 0x268   : > { %463 = vst.msk [vmem:[%s271_s25] sm:$0xff] %vm295_vm1, %v462_v52 }
 0x269   : > { %649 = shalt.err (!%p646_p3)
}
 0x26a   : > { %s650_s18 = scalar_lea.hbm %s476_s10, 128  ;;  %s654_s21 = scalar_lea.hbm %s870_s7, 256 }
 0x26b   : > { %p651_p4 = scmp.ne.s32.totalorder %s476_s10, %s650_s18  ;;  %p655_p9 = scmp.lt.s32.totalorder %s476_s10, %s870_s7 }
 0x26c   : > { %p656_p10 = scmp.lt.s32.totalorder %s654_s21, %s650_s18 }
 0x26d   : > { %p652_p7 = pnand %p651_p4, %p786_p5 }
 0x26e   : > { %p657_p11 = por %p656_p10, %p655_p9 }
 0x26f   : > { %p653_p8 = pneg %p652_p7 }
 0x271   : > { %p658_p12 = pnand %p657_p11, %p653_p8 }
 0x273   : > { %661 = shalt.err (!%p658_p12)
}
 0x274   : > { %584 = dma.vmem_to_hbm [thread:$0]  (%p786_p5), %s479_s26, 128, %s476_s10, %s465_s11  }
 0x275 PF: > { %p590_p13 = scmp.ge.s32.totalorder %s696_s8, 2  ;;  %s490_s24 = sand.u32 1, %s684_s28  }
 0x276   : > { %s491_s25 = scalar_lea.sflag [#allocation5], %s490_s24 }
 0x277   : > { %p587_p0 = pnand %p590_p13, %p790_p6 }
 0x279   : > { %p588_p1 = pneg %p587_p0 }
 0x27b   : > { %679 = dma.done.wait (%p588_p1), %s491_s25, 128  }
 0x27c   : > { %681 = vsyncadd (%p588_p1), %s491_s25, 4294967168  ;;  %p19_p2 = scmp.ge.s32.totalorder %s773_s9, 4   ;;  %s873_s28 = smov %s688_s29 }
 0x27d   : > { %s874_s29 = smov %s692_s30  ;;  %s875_s30 = smov %s784_s12 }
 0x27e   : > { %s876_s8 = smov %s773_s9  ;;  %21 = sbr.rel (!%p19_p2) target bundleno = 6 (0x6), region = 83 }
 0x283   :  { %496 = vsyncpa [#allocation5], 1 }
 0x284   :  { %498 = vsyncpa [#allocation5 + $0x1], 1 }

</bundles_post_ra>
